<compile_context>
chip_gen: v7x
topology: tpu7x:2x2x1
jax: 0.10.0
libtpu: 0.0.40
codegen_flags: <defaults>
</compile_context>

<pallas_src>
import jax
import jax.numpy as jnp
import numpy as np
from jax.experimental import pallas as pl
from jax.experimental.pallas import tpu as pltpu


def _round_up(a, b):
    return (a + b - 1) // b * b


def _scatter_mat(W, bs, dtype):
    """P2[bb, w, col] = 1 iff col == b1*(W*bs) + w*bs + b2,  bb = b1*bs + b2.

    Right-multiplying the (c_blk*H, W) slab of sub-block bb by P2[bb] scatters
    its W columns into their interleaved positions of the bs*bs*W-wide output
    row.  Each output column is hit by exactly one (bb, w), so summing the
    bs*bs contributions reproduces the permutation exactly (zeros elsewhere).
    """
    bs2 = bs * bs
    bb = jnp.arange(bs2)
    b1 = (bb // bs)[:, None, None]
    b2 = (bb % bs)[:, None, None]
    w = jnp.arange(W)[None, :, None]
    col = jnp.arange(bs2 * W)[None, None, :]
    return (col == b1 * (W * bs) + w * bs + b2).astype(dtype)


def _choose_c_blk(C_out, H, W, bs2, itemsize):
    """Largest divisor of C_out whose per-step (padded) VMEM footprint fits."""
    in_per_c = _round_up(H, 8) * _round_up(W, 128) * itemsize
    out_per_c = _round_up(H, 8) * _round_up(bs2 * W, 128) * itemsize
    acc_per_c = _round_up(H, 8) * _round_up(bs2 * W, 128) * 4   # f32 matmul result
    per_c = 2 * in_per_c + 2 * out_per_c + 2 * acc_per_c        # double buffers + temps
    p2_bytes = 2 * bs2 * _round_up(W, 8) * _round_up(bs2 * W, 128) * 4
    budget = 16 * 1024 * 1024 - p2_bytes                        # headroom under 32 MiB limit
    c_blk = 1
    for d in range(1, C_out + 1):
        if C_out % d == 0 and d * per_c <= budget:
            c_blk = d
    return c_blk


def depth_to_space(x, block_size):
    N, C, H, W = x.shape
    bs = block_size
    bs2 = bs * bs
    assert C % bs2 == 0, "C must be divisible by block_size**2"
    C_out = C // bs2

    # TODO(synk): integer dtypes would round-trip through the float MXU path
    # (exact only below 2^24); only floating-point inputs are supported here.
    if x.dtype == jnp.bfloat16 or x.dtype == jnp.float32:
        compute_dtype = x.dtype          # one-hot matmul is exact in bf16/f32
    else:
        compute_dtype = jnp.float32

    # Free, contiguous reshape (torch .view with the two block axes merged).
    x5 = x.reshape(N, bs2, C_out, H, W)
    p2 = _scatter_mat(W, bs, compute_dtype)        # (bs2, W, bs2*W), small

    itemsize = x.dtype.itemsize
    c_blk = _choose_c_blk(C_out, H, W, bs2, itemsize)
    n_cblk = C_out // c_blk

    def kernel(x_ref, p2_ref, o_ref):
        # x_ref : (1, 1, c_blk, H, W)   one (b1,b2) sub-block of c_blk channels
        # p2_ref: (bs2, W, bs2*W)       one-hot scatter matrices (VMEM-resident)
        # o_ref : (1, c_blk, H, bs2*W)  resident accumulator across the bb axis
        bb = pl.program_id(2)
        lhs = x_ref[0, 0].reshape(c_blk * H, W).astype(compute_dtype)
        contrib = jnp.dot(lhs, p2_ref[bb], preferred_element_type=jnp.float32)
        contrib = contrib.reshape(c_blk, H, bs2 * W).astype(o_ref.dtype)

        @pl.when(bb == 0)
        def _init():
            o_ref[0] = contrib

        @pl.when(bb > 0)
        def _accumulate():
            # Exactly one bb contributes to each element; the rest add exact
            # zeros, so accumulating in the output dtype is bit-exact.
            o_ref[0] = o_ref[0] + contrib

    cost = pl.CostEstimate(
        flops=2 * N * C_out * H * (W * bs2) ** 2,
        transcendentals=0,
        bytes_accessed=2 * x.size * itemsize,
    )

    y4 = pl.pallas_call(
        kernel,
        out_shape=jax.ShapeDtypeStruct((N, C_out, H, bs2 * W), x.dtype),
        grid_spec=pltpu.PrefetchScalarGridSpec(
            num_scalar_prefetch=0,
            grid=(N, n_cblk, bs2),
            in_specs=[
                # Each fetch is one contiguous c_blk*H*W*itemsize chunk of HBM.
                pl.BlockSpec((1, 1, c_blk, H, W),
                             lambda n, c, bb: (n, bb, c, 0, 0)),
                # Constant index map: P2 is DMA'd once and stays resident.
                pl.BlockSpec((bs2, W, bs2 * W),
                             lambda n, c, bb: (0, 0, 0)),
            ],
            # Same block across the bb axis -> VMEM-resident accumulator,
            # written back once per (n, c) tile, lane-dense (bs2*W wide).
            out_specs=pl.BlockSpec((1, c_blk, H, bs2 * W),
                                   lambda n, c, bb: (n, c, 0, 0)),
        ),
        compiler_params=pltpu.CompilerParams(
            dimension_semantics=("parallel", "parallel", "arbitrary"),
            vmem_limit_bytes=32 * 1024 * 1024,
        ),
        cost_estimate=cost,
    )(x5, p2)

    # Free, contiguous reshape: (N, C_out, H, bs*bs*W) -> (N, C_out, H*bs, W*bs)
    return y4.reshape(N, C_out, H * bs, W * bs)


def depth_to_space_ref(x, bs):
    # Pure-JAX reference matching the PyTorch forward exactly.
    N, C, H, W = x.shape
    C_out = C // (bs * bs)
    y = x.reshape(N, bs, bs, C_out, H, W)
    y = jnp.transpose(y, (0, 3, 4, 1, 5, 2))
    return y.reshape(N, C_out, H * bs, W * bs)


if __name__ == "__main__":
    block_size = 2
    N, C, H, W = 2, 8, 16, 16           # C must be divisible by block_size**2
    key = jax.random.PRNGKey(0)
    x = jax.random.normal(key, (N, C, H, W), dtype=jnp.float32)

    out = depth_to_space(x, block_size)
    out = jax.block_until_ready(out)

    ref = depth_to_space_ref(x, block_size)
    np.testing.assert_allclose(np.asarray(out), np.asarray(ref), rtol=0, atol=1e-6)
    assert out.shape == (N, C // block_size ** 2, H * block_size, W * block_size)
    assert out.dtype == x.dtype

    print("KERNEL_OK")
</pallas_src>

<mosaic_0001>
module attributes {stable_mosaic.version = 11 : i64} {
  func.func @kernel(%arg0: i32, %arg1: i32, %arg2: i32, %arg3: memref<1x1x2x16x16xf32, #tpu.memory_space<vmem>>, %arg4: memref<4x16x64xf32, #tpu.memory_space<vmem>>, %arg5: memref<1x2x16x64xf32, #tpu.memory_space<vmem>>) attributes {dimension_semantics = [#tpu.dimension_semantics<parallel>, #tpu.dimension_semantics<parallel>, #tpu.dimension_semantics<arbitrary>], iteration_bounds = array<i64: 2, 1, 4>, scalar_prefetch = 0 : i64, scratch_operands = 0 : i64, tpu.core_type = #tpu.core_type<tc>, window_params = [{transform_indices = @transform_0, window_bounds = array<i64: 1, 1, 2, 16, 16>}, {pipeline_mode = #tpu.pipeline_mode<synchronous>, transform_indices = @transform_1, window_bounds = array<i64: 4, 16, 64>}, {transform_indices = @transform_2, window_bounds = array<i64: 1, 2, 16, 64>}]} {
    %c0 = arith.constant 0 : index
    %c0_0 = arith.constant 0 : index
    %c0_1 = arith.constant 0 : index
    %c0_2 = arith.constant 0 : index
    %c0_3 = arith.constant 0 : index
    %0 = vector.load %arg3[%c0, %c0_0, %c0_1, %c0_2, %c0_3] : memref<1x1x2x16x16xf32, #tpu.memory_space<vmem>>, vector<1x1x2x16x16xf32>
    %1 = vector.shape_cast %0 : vector<1x1x2x16x16xf32> to vector<2x16x16xf32>
    %2 = vector.shape_cast %1 : vector<2x16x16xf32> to vector<32x16xf32>
    %3 = arith.index_cast %arg2 : i32 to index
    %c0_4 = arith.constant 0 : index
    %c0_5 = arith.constant 0 : index
    %4 = vector.load %arg4[%3, %c0_4, %c0_5] : memref<4x16x64xf32, #tpu.memory_space<vmem>>, vector<1x16x64xf32>
    %5 = vector.shape_cast %4 : vector<1x16x64xf32> to vector<16x64xf32>
    %cst = arith.constant dense<0.000000e+00> : vector<32x64xf32>
    %6 = tpu.matmul %2, %5, %cst {dimension_numbers = #tpu.dot_dimension_numbers<[1], [0], [0], [1], [0, 0, 1, 1], [], []>} : vector<32x16xf32>, vector<16x64xf32>, vector<32x64xf32> -> vector<32x64xf32>
    %7 = vector.shape_cast %6 : vector<32x64xf32> to vector<2x16x64xf32>
    %c0_i32 = arith.constant 0 : i32
    %8 = arith.cmpi eq, %arg2, %c0_i32 : i32
    %9 = arith.extui %8 : i1 to i32
    %c0_i32_6 = arith.constant 0 : i32
    %10 = arith.cmpi ne, %9, %c0_i32_6 : i32
    scf.if %10 {
      %c0_9 = arith.constant 0 : index
      %c0_10 = arith.constant 0 : index
      %c0_11 = arith.constant 0 : index
      %c0_12 = arith.constant 0 : index
      %14 = vector.load %arg5[%c0_9, %c0_10, %c0_11, %c0_12] : memref<1x2x16x64xf32, #tpu.memory_space<vmem>>, vector<1x2x16x64xf32>
      %15 = vector.shape_cast %14 : vector<1x2x16x64xf32> to vector<2x16x64xf32>
      %16 = vector.shape_cast %7 : vector<2x16x64xf32> to vector<1x2x16x64xf32>
      tpu.vector_store %arg5[%c0_9, %c0_10, %c0_11, %c0_12], %16 {strides = array<i32>} : memref<1x2x16x64xf32, #tpu.memory_space<vmem>>, vector<1x2x16x64xf32>,
    } else {
    }
    %c0_i32_7 = arith.constant 0 : i32
    %11 = arith.cmpi sgt, %arg2, %c0_i32_7 : i32
    %12 = arith.extui %11 : i1 to i32
    %c0_i32_8 = arith.constant 0 : i32
    %13 = arith.cmpi ne, %12, %c0_i32_8 : i32
    scf.if %13 {
      %c0_9 = arith.constant 0 : index
      %c0_10 = arith.constant 0 : index
      %c0_11 = arith.constant 0 : index
      %c0_12 = arith.constant 0 : index
      %14 = vector.load %arg5[%c0_9, %c0_10, %c0_11, %c0_12] : memref<1x2x16x64xf32, #tpu.memory_space<vmem>>, vector<1x2x16x64xf32>
      %15 = vector.shape_cast %14 : vector<1x2x16x64xf32> to vector<2x16x64xf32>
      %16 = arith.addf %15, %7 : vector<2x16x64xf32>
      %c0_13 = arith.constant 0 : index
      %c0_14 = arith.constant 0 : index
      %c0_15 = arith.constant 0 : index
      %c0_16 = arith.constant 0 : index
      %17 = vector.load %arg5[%c0_13, %c0_14, %c0_15, %c0_16] : memref<1x2x16x64xf32, #tpu.memory_space<vmem>>, vector<1x2x16x64xf32>
      %18 = vector.shape_cast %17 : vector<1x2x16x64xf32> to vector<2x16x64xf32>
      %19 = vector.shape_cast %16 : vector<2x16x64xf32> to vector<1x2x16x64xf32>
      tpu.vector_store %arg5[%c0_13, %c0_14, %c0_15, %c0_16], %19 {strides = array<i32>} : memref<1x2x16x64xf32, #tpu.memory_space<vmem>>, vector<1x2x16x64xf32>,
    } else {
    }
    return
  }
  func.func @transform_0(%arg0: i32, %arg1: i32, %arg2: i32) -> (i32, i32, i32, i32, i32) {
    %c0_i32 = arith.constant 0 : i32
    %c0_i32_0 = arith.constant 0 : i32
    %c0_i32_1 = arith.constant 0 : i32
    return %arg0, %arg2, %arg1, %c0_i32, %c0_i32_0 : i32, i32, i32, i32, i32
  }
  func.func @transform_1(%arg0: i32, %arg1: i32, %arg2: i32) -> (i32, i32, i32) {
    %c0_i32 = arith.constant 0 : i32
    %c0_i32_0 = arith.constant 0 : i32
    %c0_i32_1 = arith.constant 0 : i32
    %c0_i32_2 = arith.constant 0 : i32
    return %c0_i32, %c0_i32_0, %c0_i32_1 : i32, i32, i32
  }
  func.func @transform_2(%arg0: i32, %arg1: i32, %arg2: i32) -> (i32, i32, i32, i32) {
    %c0_i32 = arith.constant 0 : i32
    %c0_i32_0 = arith.constant 0 : i32
    %c0_i32_1 = arith.constant 0 : i32
    return %arg0, %arg1, %c0_i32, %c0_i32_0 : i32, i32, i32, i32
  }
}

</mosaic_0001>

<bundles_post_ra>
// kernel: tpu_custom_call.1
= control target key start
LH: loop header
LB: loop body
LE: loop exit
PB: predicated region body
PF: predicated region fallthrough
CT: control target
= control target key end

     0   :  { %s1119_s0 = inlined_call_operand.hbm [shape: f32[2,4,2,16,16], index: 0, kind: input, shape index: {}]   ;;  %s1120_s1 = inlined_call_operand.hbm [shape: f32[4,16,64], index: 1, kind: input, shape index: {}]   ;;  %s1121_s2 = inlined_call_operand.hbm [shape: f32[2,2,16,64], index: 2, kind: output, shape index: {}]  }
   0x1   :  { %1134 = sst [smem:[#allocation15_spill]] %s1120_s1 }
   0x2   :  { %1135 = sst [smem:[#allocation16_spill]] %s1121_s2 }
   0x3   :  { %7 = vsyncpa [#allocation3], 0 }
   0x4   :  { %9 = vsyncpa [#allocation3 + $0x1], 0 }
   0x5   :  { %10 = vsyncpa [#allocation6], 0 }
   0x6   :  { %11 = vsyncpa [#allocation4], 0 }
   0x7   :  { %13 = vsyncpa [#allocation4 + $0x1], 0  ;;  %s838_s9 = smov 0   ;;  %s840_s10 = smov 0  }
   0x8   :  { %s842_s11 = smov 0   ;;  %s844_s12 = smov 0  }
   0x9   :  { %s846_s13 = smov 0   ;;  %s848_s14 = smov 0  }
   0xa   :  { %s850_s15 = smov 0   ;;  %s852_s16 = smov 0  }
   0xb   :  { %s854_s17 = smov 0   ;;  %s856_s18 = smov 0  }
   0xc   :  { %s858_s19 = smov 0  }
   0xd LB: > { %1136 = sst [smem:[#allocation11_spill]] %s774_s9  ;;  %s465_s20 = sadd.s32 4294967295, %s814_s19   ;;  %s814_s19 = sphi %s858_s19, %s19_s19   ;;  %s810_s18 = sphi %s856_s18, %s1171_s18   ;;  %s806_s17 = sphi %s854_s17, %s1170_s17   ;;  %s802_s16 = sphi %s852_s16, %s1169_s16   ;;  %s798_s15 = sphi %s850_s15, %s1168_s15   ;;  %s794_s14 = sphi %s848_s14, %s1167_s14   ;;  %s790_s13 = sphi %s846_s13, %s1166_s13   ;;  %s786_s12 = sphi %s844_s12, %s1165_s12   ;;  %s782_s11 = sphi %s842_s11, %s1164_s11   ;;  %s778_s10 = sphi %s840_s10, %s1163_s10   ;;  %s774_s9 = sphi %s838_s9, %s1162_s9  }
   0xe   : > { %s466_s21 = sadd.s32 4294967294, %s814_s19   ;;  %p62_p0 = scmp.ne.s32.totalorder %s790_s13, %s786_s12 }
   0xf   : > { %p894_p1 = scmp.eq.s32.totalorder %s465_s20, 0  ;;  %s98_s23 = sadd.s32 1, %s782_s11 }
  0x10   : > { %p108_p2 = scmp.ne.s32.totalorder %s782_s11, %s778_s10  ;;  %p109_p4 = scmp.eq.s32.totalorder %s465_s20, 7 }
  0x11   : > { %s1137_s22 = scalar_select %p894_p1, 1, 0 }
  0x12   : > { %p903_p3 = por %p894_p1, %p62_p0  ;;  %p114_p5 = scmp.ne.s32.totalorder %s778_s10, %s774_s9 }
  0x13   : > { %p115_p6 = scmp.eq.s32.totalorder %s466_s21, 7  ;;  %p909_p7 = por %p109_p4, %p108_p2 }
  0x14   : > { %s1138_s24 = scalar_select %p903_p3, 1, 0 }
  0x15   : > { %s1139_s25 = scalar_select %p909_p7, 1, 0 }
  0x16   : > { %p467_p8 = scmp.ge.s32.totalorder %s814_s19, 1  ;;  %p914_p9 = por %p115_p6, %p114_p5 }
  0x17   : > { %p122_p10 = scmp.lt.s32.totalorder %s814_s19, 9  ;;  %s816_s28 = smov [#allocation5]  }
  0x18   : > { %s1140_s26 = scalar_select %p914_p9, 1, 0 }
  0x19   : > { %p919_p11 = pnand %p467_p8, %p122_p10  ;;  %s134_s29 = sshll.u32 %s816_s28, 4  ;;  %s135_s29 = int_to_ptr.vmem [resolvable:$true] %s134_s29 }
  0x1a   : > { %1141 = sst [smem:[#allocation12_spill]] %s1140_s26  ;;  %s1144_s1 = sld [smem:[#allocation15_spill]] }
  0x1b   : > { %s1142_s27 = scalar_select %p919_p11, 1, 0 }
  0x1c   : > { %p521_p12 = pneg %p919_p11 }
  0x1e   : > { %p927_p13 = pnand %p521_p12, %p894_p1 }
  0x20   : > { %s630_s5 = scalar_lea.hbm %s1144_s1, 1024  ;;  %p632_p2 = pneg %p927_p13 }
  0x21   : > { %p631_p0 = scmp.ne.s32.totalorder %s1144_s1, %s630_s5  ;;  %p637_p6 = scmp.lt.u32.totalorder %s630_s5, %s1144_s1 }
  0x23   : > { %p633_p4 = pnand %p632_p2, %p631_p0 }
  0x25   : > { %p634_p5 = pneg %p633_p4 }
  0x27   : > { %p639_p8 = pnand %p637_p6, %p634_p5 }
  0x29   : > { %642 = shalt.err (!%p639_p8)
}
  0x2a   : > { %s643_s20 = scalar_lea.vmem %s135_s29, 1024  ;;  %p651_p7 = scmp.lt.s32.totalorder %s135_s29, %s135_s29 }
  0x2b   : > { %p644_p10 = scmp.ne.s32.totalorder %s135_s29, %s643_s20  ;;  %p652_p1 = scmp.lt.s32.totalorder %s643_s20, %s643_s20 }
  0x2d   : > { %p646_p12 = pnand %p644_p10, %p632_p2  ;;  %p653_p3 = por %p652_p1, %p651_p7 }
  0x2f   : > { %p647_p9 = pneg %p646_p12 }
  0x31   : > { %p654_p11 = pnand %p653_p3, %p647_p9 }
  0x33   : > { %657 = shalt.err (!%p654_p11)
}
  0x34   : > { %s1127_s21 = smov 128   ;;  %s1128_s28 = smov 8  }
  0x35   : > { %524 = dma.hbm_to_vmem [thread:$0]  (!%p927_p13), %s1144_s1, 1024, %s135_s29, [#allocation6], %s1127_s21, %s1127_s21, %s1128_s28  }
  0x36   : > { %s31_s5 = sadd.s32 1, %s806_s17  ;;  %s38_s6 = sadd.s32 1, %s810_s18 }
  0x37   : > { %p32_p1 = scmp.ge.s32.totalorder %s31_s5, 4  ;;  %s49_s7 = sadd.s32 1, %s794_s14 }
  0x38   : > { %p56_p3 = scmp.ne.s32.totalorder %s794_s14, %s790_s13  ;;  %p57_p7 = scmp.eq.s32.totalorder %s814_s19, 0 }
  0x39   : > { %s1173_s5 = smov (%p32_p1, %s31_s5), 0  ;;  %s1175_s6 = smov (!%p32_p1, %s38_s6), %s810_s18 }
  0x3a   : > { %1145 = sst [smem:[#allocation13_spill]] %s1173_s5  ;;  %s43_s30 = ssub.s32 %s806_s17, %s1173_s5 }
  0x3b   : > { %p40_p9 = scmp.ge.s32.totalorder %s1175_s6, 2  ;;  %p534_p11 = scmp.lt.s32.totalorder %s814_s19, 8 }
  0x3c   : > { %p962_p13 = por %p57_p7, %p56_p3  ;;  %s148_s8 = sand.u32 1, %s794_s14  }
  0x3d   : > { %s1177_s6 = smov (%p40_p9, %s1175_s6), 0  ;;  %s470_s12 = sshll.u32 %s148_s8, 5 }
  0x3e   : > { %1147 = sst [smem:[#allocation14_spill]] %s1177_s6  ;;  %s42_s20 = ssub.s32 %s810_s18, %s1177_s6 }
  0x3f   : > { %s44_s3 = sor.u32 %s43_s30, %s42_s20  ;;  %p96_p0 = scmp.eq.s32.totalorder %s42_s20, 0 }
  0x40   : > { %p47_p2 = scmp.eq.s32.totalorder %s44_s3, 0  ;;  %s471_s4 = sshll.u32 %s806_s17, 2 }
  0x41   : > { %s975_s21 = scalar_select %p96_p0, %s782_s11, %s98_s23  }
  0x42   : > { %s978_s28 = scalar_select %p47_p2, %s794_s14, %s49_s7  }
  0x43   : > { %s472_s1 = sshll.u32 %s810_s18, 4  ;;  %s152_s5 = scalar_lea.vmem [#allocation2], %s470_s12 }
  0x44   : > { %s164_s26 = sshll.u32 %s152_s5, 4  ;;  %s161_s9 = sadd.s32 %s472_s1, %s471_s4  ;;  %s981_s26 = int_to_ptr.vmem [resolvable:$true] %s164_s26 }
  0x45   : > { %s473_s2 = sshll.u32 %s161_s9, 7  ;;  %p987_p4 = pnand %p534_p11, %p962_p13 }
  0x46   : > { %s994_s23 = scalar_lea.hbm %s1119_s0, %s473_s2  ;;  %s996_s1 = scalar_lea.sflag [#allocation3], %s148_s8 }
  0x47   : > { %s658_s9 = scalar_lea.hbm %s994_s23, 512  ;;  %p660_p6 = pneg %p987_p4 }
  0x48   : > { %p659_p5 = scmp.ne.s32.totalorder %s994_s23, %s658_s9  ;;  %s663_s29 = scalar_lea.hbm %s1119_s0, 4096 }
  0x49   : > { %p664_p12 = scmp.lt.u32.totalorder %s994_s23, %s1119_s0  ;;  %p665_p1 = scmp.lt.u32.totalorder %s663_s29, %s658_s9 }
  0x4a   : > { %p661_p8 = pnand %p660_p6, %p659_p5  ;;  %p667_p7 = scmp.lt.u32.totalorder %s658_s9, %s994_s23 }
  0x4b   : > { %p666_p3 = por %p665_p1, %p664_p12 }
  0x4c   : > { %p662_p10 = pneg %p661_p8 }
  0x4d   : > { %p668_p9 = por %p667_p7, %p666_p3 }
  0x4f   : > { %p669_p11 = pnand %p668_p9, %p662_p10 }
  0x51   : > { %672 = shalt.err (!%p669_p11)
}
  0x52   : > { %s673_s8 = scalar_lea.vmem %s981_s26, 512  ;;  %s819_s3 = smov [#allocation2]  }
  0x53   : > { %p674_p13 = scmp.ne.s32.totalorder %s981_s26, %s673_s8  ;;  %s678_s4 = sshll.u32 %s819_s3, 4  ;;  %s679_s4 = int_to_ptr.vmem [resolvable:$false] %s678_s4 }
  0x54   : > { %s680_s30 = scalar_lea.vmem %s679_s4, 1024  ;;  %p681_p5 = scmp.lt.s32.totalorder %s981_s26, %s679_s4 }
  0x55   : > { %p676_p0 = pnand %p674_p13, %p660_p6  ;;  %p682_p8 = scmp.lt.s32.totalorder %s680_s30, %s673_s8 }
  0x57   : > { %p677_p2 = pneg %p676_p0  ;;  %p683_p12 = por %p682_p8, %p681_p5 }
  0x59   : > { %p684_p1 = pnand %p683_p12, %p677_p2 }
  0x5b   : > { %687 = shalt.err (!%p684_p1)
}
  0x5c   : > { %s1149_s20 = smov 8   ;;  %s1150_s9 = smov 128  }
  0x5d   : > { %528 = dma.hbm_to_vmem [thread:$0]  (!%p987_p4), %s994_s23, 512, %s981_s26, %s996_s1, %s1150_s9, %s1150_s9, %s1149_s20  }
  0x5e   : > { %p1151_p6 = scmp.ne.s32.totalorder %s1142_s27, 0 }
  0x5f   : > { %s178_s5 = sand.u32 (!%p1151_p6), 1, %s790_s13   ;;  %p1152_p10 = scmp.ne.s32.totalorder (!%p1151_p6), %s1138_s24, 0 }
  0x60   : > { %176 = sbr.rel (%p1151_p6) target bundleno = 369 (0x171), region = 28  ;;  %s475_s7 = sshll.u32 (!%p1151_p6), %s178_s5, 5 }
  0x61   : > { %s179_s29 = scalar_lea.sflag (!%p1151_p6), [#allocation3], %s178_s5  ;;  %s182_s2 = scalar_lea.vmem (!%p1151_p6), [#allocation2], %s475_s7 }
  0x67   : > { %761 = dma.done.wait (%p1152_p10), %s179_s29, 512  }
  0x68   : > { %763 = vsyncadd (%p1152_p10), %s179_s29, 4294966784  ;;  %p1153_p3 = scmp.ne.s32.totalorder %s1137_s22, 0 }
  0x6a   : > { %765 = dma.done.wait (%p1153_p3), [#allocation6], 1024  }
  0x6b   : > { %767 = vsyncadd (%p1153_p3), [#allocation6], 4294966272  ;;  %s204_s26 = sand.u32 1, %s778_s10   ;;  %s478_s6 = sshll.u32 %s798_s15, 4  ;;  %vm217_vm0 = vcmask 130048   ;;  %v209_v2 = vld [vmem:[%s182_s2] sm:$0xff] }
  0x6c   : > { %s477_s27 = sshll.u32 %s204_s26, 5  ;;  %s214_s23 = scalar_lea.vmem [#allocation5], %s478_s6  ;;  %501 = vmatprep.mubr.msk.f32.mxu0 %vm217_vm0, %v209_v2  ;;  %v211_v4 = vld [vmem:[%s182_s2 + $0x10] sm:$0xff]  ;;  %v210_v5 = vld [vmem:[%s182_s2 + $0x8] sm:$0xff]  ;;  %v212_v6 = vld [vmem:[%s182_s2 + $0x18] sm:$0xff] }
  0x6d   : > { %v215_v0 = vld [vmem:[%s214_s23] sm:$0xff]  ;;  %v216_v1 = vld [vmem:[%s214_s23 + $0x8] sm:$0xff]  ;;  %504 = vmatprep.mubr.msk.f32.mxu1 %vm217_vm0, %v211_v4  ;;  %s206_s22 = scalar_lea.vmem [#allocation7], %s477_s27  ;;  %p483_p4 = scmp.ne.s32.totalorder %s798_s15, 0 }
  0x6e   : > { %v507_v3 = vpack.c.bf16 %v216_v1, %v215_v0  ;;  %vm319_vm1 = vcmask (!%p483_p4), 523264  }
  0x70   : > { %508 = vmatprep.subr.bf16.mxu0 %v507_v3  ;;  %511 = vmatprep.subr.bf16.mxu1 %v507_v3 }
  0x71   : > { %510 = vmatpush3.bf16.msra.mxu0 %v507_v3  ;;  %512 = vmatpush3.bf16.msra.mxu1 %v507_v3 }
  0x74   : > { %502 = vmatmul.mubr.msk.f32.vlgmr.msra.gmra.mrb[0].mxu0 %vm217_vm0, %v210_v5  ;;  %505 = vmatmul.mubr.msk.f32.vlgmr.msra.gmra.mrb[0].mxu1 %vm217_vm0, %v212_v6 }
 0x142   : > { %318 = sbr.rel (%p483_p4) target bundleno = 330 (0x14a), region = 40 }
 0x147   : > { %v503_v7 = vpop.f32.mrb[0].mxu0  ;;  %v506_v8 = vpop.f32.mrb[0].mxu1 }
 0x148   : > { %v296_v9 = vpop.f32.mrb[1].mxu0  ;;  %v306_v10 = vpop.f32.mrb[1].mxu1  ;;  %321 = vst.msk [vmem:[%s206_s22 + $0x8] sm:$0xff] (!%p483_p4), %vm319_vm1, %v503_v7  ;;  %323 = vst.msk [vmem:[%s206_s22 + $0x18] sm:$0xff] (!%p483_p4), %vm319_vm1, %v506_v8 }
 0x149   : > { %320 = vst.msk [vmem:[%s206_s22] sm:$0xff] %vm319_vm1, %v296_v9  ;;  %322 = vst.msk [vmem:[%s206_s22 + $0x10] sm:$0xff] %vm319_vm1, %v306_v10 }
 0x14a PF: > { %p484_p7 = scmp.le.s32.totalorder %s798_s15, 0 }
 0x14b   : > { %vm336_vm2 = vcmask (!%p484_p7), 523264  }
 0x14c   : > { %327 = sbr.rel (%p484_p7) target bundleno = 341 (0x155), region = 44 }
 0x150   : > { %v328_v11 = vld [vmem:[%s206_s22] sm:$0xff] (!%p484_p7)  ;;  %v329_v12 = vld [vmem:[%s206_s22 + $0x8] sm:$0xff] (!%p484_p7)  ;;  %v330_v13 = vld [vmem:[%s206_s22 + $0x10] sm:$0xff] (!%p484_p7) }
 0x151   : > { %v332_v14 = vadd.f32 (!%p484_p7), %v328_v11, %v296_v9  ;;  %v333_v15 = vadd.f32 (!%p484_p7), %v503_v7, %v329_v12  ;;  %v334_v16 = vadd.f32 (!%p484_p7), %v330_v13, %v306_v10  ;;  %v331_v17 = vld [vmem:[%s206_s22 + $0x18] sm:$0xff] (!%p484_p7) }
 0x152   : > { %v335_v18 = vadd.f32 (!%p484_p7), %v506_v8, %v331_v17 }
 0x153   : > { %337 = vst.msk [vmem:[%s206_s22] sm:$0xff] %vm336_vm2, %v332_v14  ;;  %338 = vst.msk [vmem:[%s206_s22 + $0x8] sm:$0xff] %vm336_vm2, %v333_v15 }
 0x154   : > { %339 = vst.msk [vmem:[%s206_s22 + $0x10] sm:$0xff] %vm336_vm2, %v334_v16  ;;  %340 = vst.msk [vmem:[%s206_s22 + $0x18] sm:$0xff] %vm336_vm2, %v335_v18 }
 0x155 PF: > { %s490_s24 = sshll.u32 %s802_s16, 9  ;;  %s1154_s12 = sld [smem:[#allocation16_spill]] }
 0x156   : > { %s358_s4 = sshll.u32 %s206_s22, 4  ;;  %s1058_s30 = scalar_lea.sflag [#allocation4], %s204_s26  ;;  %s1054_s4 = int_to_ptr.vmem [resolvable:$true] %s358_s4 }
 0x157   : > { %s688_s20 = scalar_lea.vmem %s1054_s4, 512  ;;  %p1156_p11 = scmp.ne.s32.totalorder %s1139_s25, 0 }
 0x158   : > { %p689_p9 = scmp.ne.s32.totalorder %s1054_s4, %s688_s20  ;;  %s820_s16 = smov [#allocation7]  }
 0x159   : > { %s692_s9 = sshll.u32 %s820_s16, 4  ;;  %s693_s9 = int_to_ptr.vmem [resolvable:$false] %s692_s9 }
 0x15a   : > { %p690_p13 = pnand %p689_p9, %p1156_p11  ;;  %s694_s5 = scalar_lea.vmem %s693_s9, 1024 }
 0x15b   : > { %s1155_s8 = smov %s1154_s12  ;;  %s1052_s3 = scalar_lea.hbm %s1154_s12, %s490_s24 }
 0x15c   : > { %p691_p0 = pneg %p690_p13  ;;  %p695_p2 = scmp.lt.s32.totalorder %s1054_s4, %s693_s9 }
 0x15d   : > { %p696_p5 = scmp.lt.s32.totalorder %s694_s5, %s688_s20 }
 0x15f   : > { %p697_p8 = por %p696_p5, %p695_p2 }
 0x161   : > { %p698_p12 = pnand %p697_p8, %p691_p0 }
 0x163   : > { %701 = shalt.err (!%p698_p12)
}
 0x164   : > { %s702_s7 = scalar_lea.hbm %s1052_s3, 512  ;;  %s706_s26 = scalar_lea.hbm %s1155_s8, 1024 }
 0x165   : > { %p703_p1 = scmp.ne.s32.totalorder %s1052_s3, %s702_s7  ;;  %p707_p3 = scmp.lt.u32.totalorder %s1052_s3, %s1155_s8 }
 0x166   : > { %p708_p4 = scmp.lt.u32.totalorder %s706_s26, %s702_s7  ;;  %p710_p9 = scmp.lt.u32.totalorder %s702_s7, %s1052_s3 }
 0x167   : > { %p704_p6 = pnand %p703_p1, %p1156_p11 }
 0x168   : > { %p709_p7 = por %p708_p4, %p707_p3 }
 0x169   : > { %p705_p10 = pneg %p704_p6 }
 0x16a   : > { %p711_p13 = por %p710_p9, %p709_p7 }
 0x16c   : > { %p712_p0 = pnand %p711_p13, %p705_p10 }
 0x16e   : > { %715 = shalt.err (!%p712_p0)
}
 0x16f   : > { %s821_s23 = smov 128   ;;  %s822_s22 = smov 8  }
 0x170   : > { %519 = dma.vmem_to_hbm [thread:$0]  (%p1156_p11), %s1054_s4, 512, %s1052_s3, %s1058_s30, %s821_s23, %s821_s23, %s822_s22  }
 0x171 PF: > { %s1157_s24 = sld [smem:[#allocation11_spill]]  ;;  %s1158_s15 = sld [smem:[#allocation12_spill]] }
 0x172   : > { %p536_p2 = scmp.ge.s32.totalorder %s814_s19, 2 }
 0x177   : > { %s373_s1 = sand.u32 1, %s1157_s24   ;;  %p1159_p5 = scmp.ne.s32.totalorder %s1158_s15, 0 }
 0x178   : > { %s374_s12 = scalar_lea.sflag [#allocation4], %s373_s1 }
 0x179   : > { %p530_p8 = pnand %p536_p2, %p1159_p5 }
 0x17b   : > { %769 = dma.done.wait (!%p530_p8), %s374_s12, 512  }
 0x17c   : > { %771 = vsyncadd (!%p530_p8), %s374_s12, 4294966784  ;;  %s19_s19 = sadd.s32 1, %s814_s19   ;;  %s1160_s25 = sld [smem:[#allocation13_spill]] }
 0x17d   : > { %p16_p12 = scmp.ge.s32.totalorder %s19_s19, 10   ;;  %s1161_s3 = sld [smem:[#allocation14_spill]] }
 0x17e   : > { %s1162_s9 = smov %s778_s10  ;;  %s1163_s10 = smov %s782_s11 }
 0x17f   : > { %s1164_s11 = smov %s975_s21  ;;  %s1165_s12 = smov %s790_s13 }
 0x180   : > { %s1166_s13 = smov %s794_s14  ;;  %s1167_s14 = smov %s978_s28 }
 0x181   : > { %s1168_s15 = smov %s806_s17  ;;  %s1169_s16 = smov %s810_s18 }
 0x182   : > { %s1170_s17 = smov %s1160_s25  ;;  %18 = sbr.rel (!%p16_p12) target bundleno = 13 (0xd), region = 86 }
 0x183   : > { %s1171_s18 = smov %s1161_s3 }
 0x189   :  { %379 = vsyncpa [#allocation3], 1 }
 0x18a   :  { %381 = vsyncpa [#allocation3 + $0x1], 1 }
 0x18b   :  { %382 = vsyncpa [#allocation6], 1 }
 0x18c   :  { %383 = vsyncpa [#allocation4], 1 }
 0x18d   :  { %385 = vsyncpa [#allocation4 + $0x1], 1 }

</bundles_post_ra>
